<compile_context>
chip_gen: v5e
topology: v5e:2x2
jax: 0.10.0
libtpu: 0.0.40
codegen_flags: <defaults>
</compile_context>

<pallas_src>
import functools

import jax
import jax.numpy as jnp
from jax.experimental import pallas as pl
from jax.experimental.pallas import tpu as pltpu

SMOOTH = 1.0
LANES = 128
MAX_ROWS_PER_BLOCK = 8192   # 8192 rows * 128 lanes * 4 B = 4 MiB per f32 input block
MIN_ROWS_PER_BLOCK = 1024   # don't shrink blocks below this hunting for an exact divisor
SUB_SLICE_ROWS = 512        # rows per in-kernel static sub-slice (at Bb == 1)


# ---------------------------------------------------------------------------
# Kernel helpers
# ---------------------------------------------------------------------------
def _partial_sums(p, t):
    """p, t: (Bb, size, 128) f32.  Returns (inter, total), each (Bb, 8, 128):
    lane/sublane-parallel partial sums of p*t and p+t using vreg-wise adds
    only; the 8->1 / 128->1 collapse happens once, in the JAX wrapper."""
    bb, size, _ = p.shape
    size8 = (size // 8) * 8
    inter = jnp.zeros((bb, 8, LANES), jnp.float32)
    total = jnp.zeros((bb, 8, LANES), jnp.float32)
    if size8:
        p4 = p[:, :size8, :].reshape(bb, size8 // 8, 8, LANES)
        t4 = t[:, :size8, :].reshape(bb, size8 // 8, 8, LANES)
        inter = inter + jnp.sum(p4 * t4, axis=1)
        total = total + jnp.sum(p4 + t4, axis=1)
    if size8 < size:
        # <8 leftover rows: pad with zeros (neutral for both sums) to a vreg.
        pad = jnp.zeros((bb, 8 - (size - size8), LANES), jnp.float32)
        pr = jnp.concatenate([p[:, size8:, :], pad], axis=1)
        tr = jnp.concatenate([t[:, size8:, :], pad], axis=1)
        inter = inter + pr * tr
        total = total + pr + tr
    return inter, total


def _accumulate(pred_ref, target_ref, inter_ref, total_ref, size, sub_rows):
    """Accumulate rows [0, size) of the current (Bb, rows_per_block, 128)
    block into the resident (Bb, 8, 128) output accumulators.  `size` and
    `sub_rows` are static; static sub-slices bound live ranges and avoid a
    block-sized elementwise temporary in VMEM."""
    bb = inter_ref.shape[0]
    acc_i = jnp.zeros((bb, 8, LANES), jnp.float32)
    acc_t = jnp.zeros((bb, 8, LANES), jnp.float32)
    for start in range(0, size, sub_rows):
        sub = min(sub_rows, size - start)
        p = pred_ref[:, start:start + sub, :].astype(jnp.float32)
        t = target_ref[:, start:start + sub, :].astype(jnp.float32)
        di, dt = _partial_sums(p, t)
        acc_i = acc_i + di
        acc_t = acc_t + dt
    inter_ref[...] += acc_i
    total_ref[...] += acc_t


def _dice_kernel(pred_ref, target_ref, inter_ref, total_ref, *,
                 rows_per_block, n_chunks, chunks_per_split, tail_rows,
                 sub_rows, has_overshoot):
    """grid = (split, batch_group, chunk).  The two leading axes are
    'parallel'; the chunk axis is the reduction and revisits the same output
    block, which doubles as the accumulator."""
    k = pl.program_id(2)

    @pl.when(k == 0)
    def _():
        inter_ref[...] = jnp.zeros_like(inter_ref)
        total_ref[...] = jnp.zeros_like(total_ref)

    if n_chunks == 1 or (tail_rows == rows_per_block and not has_overshoot):
        # Hot path: every chunk is dense -> zero masking / bookkeeping work.
        _accumulate(pred_ref, target_ref, inter_ref, total_ref,
                    rows_per_block, sub_rows)
    else:
        g = pl.program_id(0) * chunks_per_split + k   # global chunk index
        last = n_chunks - 1

        @pl.when(g < last)
        def _():
            _accumulate(pred_ref, target_ref, inter_ref, total_ref,
                        rows_per_block, sub_rows)

        @pl.when(g == last)
        def _():  # ragged tail: static slice of the valid rows, no mask
            _accumulate(pred_ref, target_ref, inter_ref, total_ref,
                        tail_rows, sub_rows)
        # g > last only happens for the overshoot step of an odd chunk count
        # under the 2-way split; its (clamped) input block is simply ignored.


# ---------------------------------------------------------------------------
# Wrapper-side static tiling decisions
# ---------------------------------------------------------------------------
def _pick_rows_per_block(rows):
    if rows <= MAX_ROWS_PER_BLOCK:
        return rows
    # Prefer a block size that divides `rows` exactly so every chunk is dense.
    for d in range(MAX_ROWS_PER_BLOCK, MIN_ROWS_PER_BLOCK - 1, -8):
        if rows % d == 0:
            return d
    return MAX_ROWS_PER_BLOCK   # fall back to a ragged last chunk


def _pick_batch_block(b, rows):
    """Fuse several batch rows per grid step when one batch's data is small,
    but keep >= 2 grid steps when possible so both v7x TensorCores get work."""
    cap = min(b, max(1, MAX_ROWS_PER_BLOCK // max(rows, 1)))
    if b > 1:
        cap = min(cap, max(1, b // 2))
    best = 1
    for d in range(1, cap + 1):
        if b % d == 0:
            best = d
    return best


def dice_loss(pred, target):
    """pred, target: (B, ...) arrays (NCHW in the reference module).
    Returns scalar 1 - mean_b[(2*sum(p*t)+1)/(sum(p)+sum(t)+1)]."""
    assert pred.shape == target.shape
    b = pred.shape[0]
    n = 1
    for d in pred.shape[1:]:
        n *= d

    f32 = jnp.dtype(jnp.float32)
    bf16 = jnp.dtype(jnp.bfloat16)

    def _prep(x):
        x = x.reshape(b, n)
        if x.dtype not in (f32, bf16):
            x = x.astype(jnp.float32)            # bool / int masks -> f32
        if n % LANES:
            x = jnp.pad(x, ((0, 0), (0, LANES - n % LANES)))
        return x

    p = _prep(pred)
    t = _prep(target)
    rows = p.shape[1] // LANES
    p = p.reshape(b, rows, LANES)
    t = t.reshape(b, rows, LANES)

    rows_per_block = _pick_rows_per_block(rows)
    n_chunks = -(-rows // rows_per_block)
    tail_rows = rows - (n_chunks - 1) * rows_per_block

    # bf16 pass-through only when the row block respects bf16's (16, 128)
    # sublane packing (or covers the full per-batch extent).
    def _maybe_upcast(x):
        if x.dtype == bf16 and not (rows_per_block == rows
                                    or rows_per_block % 16 == 0):
            return x.astype(jnp.float32)
        return x
    p = _maybe_upcast(p)
    t = _maybe_upcast(t)

    bb = _pick_batch_block(b, rows) if n_chunks == 1 else 1
    # 2-way chunk split keeps both v7x TensorCores busy when B is 1 / odd.
    n_splits = 2 if (bb == 1 and n_chunks >= 2 and b % 2 == 1) else 1
    chunks_per_split = -(-n_chunks // n_splits)
    has_overshoot = n_splits * chunks_per_split > n_chunks
    sub_rows = max(8, (SUB_SLICE_ROWS // bb) // 8 * 8)

    def in_map(s, i, k):
        g = s * chunks_per_split + k
        if has_overshoot:       # keep the (ignored) overshoot step in-bounds
            g = jnp.minimum(g, n_chunks - 1)
        return (i, g, 0)

    in_spec = pl.BlockSpec((bb, rows_per_block, LANES), in_map)
    # Lane-dense (8, 128) output blocks -> unmasked full-vreg stores.
    out_spec = pl.BlockSpec((bb, None, 8, LANES), lambda s, i, k: (i, s, 0, 0))
    out_sds = jax.ShapeDtypeStruct((b, n_splits, 8, LANES), jnp.float32)

    in_block_bytes = bb * rows_per_block * LANES * (p.dtype.itemsize +
                                                    t.dtype.itemsize)
    out_block_bytes = 2 * bb * 8 * LANES * 4
    # Double-buffered blocks + 16 MiB headroom; max ~33 MiB, well under v7x's
    # 64 MiB physical VMEM and above v5e's 16 MiB scoped default.
    vmem_limit = int(2 * (in_block_bytes + out_block_bytes) + (16 << 20))

    kernel = functools.partial(
        _dice_kernel,
        rows_per_block=rows_per_block, n_chunks=n_chunks,
        chunks_per_split=chunks_per_split, tail_rows=tail_rows,
        sub_rows=sub_rows, has_overshoot=has_overshoot)

    inter_out, total_out = pl.pallas_call(
        kernel,
        out_shape=[out_sds, out_sds],
        grid_spec=pltpu.PrefetchScalarGridSpec(
            num_scalar_prefetch=0,
            grid=(n_splits, b // bb, chunks_per_split),
            in_specs=[in_spec, in_spec],
            out_specs=[out_spec, out_spec],
        ),
        compiler_params=pltpu.CompilerParams(
            dimension_semantics=("parallel", "parallel", "arbitrary"),
            vmem_limit_bytes=vmem_limit,
        ),
    )(p, t)

    # Tiny scalar epilogue (a few KiB) stays in XLA so all kernel grid axes
    # except the reduction remain "parallel".
    inter = jnp.sum(inter_out, axis=(1, 2, 3))     # (B,) sum(pred * target)
    total = jnp.sum(total_out, axis=(1, 2, 3))     # (B,) sum(pred) + sum(target)
    dice = (2.0 * inter + SMOOTH) / (total + SMOOTH)
    return 1.0 - jnp.sum(dice) / b


def _dice_loss_ref(pred, target):
    b = pred.shape[0]
    p = pred.reshape(b, -1).astype(jnp.float32)
    t = target.reshape(b, -1).astype(jnp.float32)
    inter = jnp.sum(p * t, axis=1)
    dice = (2.0 * inter + SMOOTH) / (jnp.sum(p, axis=1) + jnp.sum(t, axis=1) + SMOOTH)
    return 1.0 - jnp.sum(dice) / b


if __name__ == "__main__":
    key = jax.random.PRNGKey(0)
    k1, k2 = jax.random.split(key)
    # Small segmentation-style input: (B, C, H, W)
    B, C, H, W = 2, 4, 16, 16
    pred = jax.nn.sigmoid(jax.random.normal(k1, (B, C, H, W), dtype=jnp.float32))
    target = (jax.random.uniform(k2, (B, C, H, W)) > 0.5).astype(jnp.float32)

    loss = dice_loss(pred, target)
    jax.block_until_ready(loss)

    ref = _dice_loss_ref(pred, target)
    assert jnp.allclose(loss, ref, atol=1e-5, rtol=1e-5), (loss, ref)
    print("KERNEL_OK")
</pallas_src>

<mosaic_0001>
module attributes {stable_mosaic.version = 11 : i64} {
  func.func @_dice_kernel(%arg0: i32, %arg1: i32, %arg2: i32, %arg3: memref<1x8x128xf32, #tpu.memory_space<vmem>>, %arg4: memref<1x8x128xf32, #tpu.memory_space<vmem>>, %arg5: memref<1x1x8x128xf32, #tpu.memory_space<vmem>>, %arg6: memref<1x1x8x128xf32, #tpu.memory_space<vmem>>) attributes {dimension_semantics = [#tpu.dimension_semantics<parallel>, #tpu.dimension_semantics<parallel>, #tpu.dimension_semantics<arbitrary>], iteration_bounds = array<i64: 1, 2, 1>, scalar_prefetch = 0 : i64, scratch_operands = 0 : i64, tpu.core_type = #tpu.core_type<tc>, window_params = [{transform_indices = @transform_0, window_bounds = array<i64: 1, 8, 128>}, {transform_indices = @transform_1, window_bounds = array<i64: 1, 8, 128>}, {transform_indices = @transform_2, window_bounds = array<i64: 1, 1, 8, 128>}, {transform_indices = @transform_3, window_bounds = array<i64: 1, 1, 8, 128>}]} {
    %c0_i32 = arith.constant 0 : i32
    %0 = arith.cmpi eq, %arg2, %c0_i32 : i32
    %1 = arith.extui %0 : i1 to i32
    %c0_i32_0 = arith.constant 0 : i32
    %2 = arith.cmpi ne, %1, %c0_i32_0 : i32
    scf.if %2 {
      %cst_27 = arith.constant 0.000000e+00 : f32
      %31 = vector.broadcast %cst_27 : f32 to vector<1x8x128xf32>
      %c0_28 = arith.constant 0 : index
      %c0_29 = arith.constant 0 : index
      %c0_30 = arith.constant 0 : index
      %c0_31 = arith.constant 0 : index
      %32 = vector.load %arg5[%c0_28, %c0_29, %c0_30, %c0_31] : memref<1x1x8x128xf32, #tpu.memory_space<vmem>>, vector<1x1x8x128xf32>
      %33 = vector.shape_cast %32 : vector<1x1x8x128xf32> to vector<1x8x128xf32>
      %34 = vector.shape_cast %31 : vector<1x8x128xf32> to vector<1x1x8x128xf32>
      tpu.vector_store %arg5[%c0_28, %c0_29, %c0_30, %c0_31], %34 {strides = array<i32>} : memref<1x1x8x128xf32, #tpu.memory_space<vmem>>, vector<1x1x8x128xf32>,
      %cst_32 = arith.constant 0.000000e+00 : f32
      %35 = vector.broadcast %cst_32 : f32 to vector<1x8x128xf32>
      %c0_33 = arith.constant 0 : index
      %c0_34 = arith.constant 0 : index
      %c0_35 = arith.constant 0 : index
      %c0_36 = arith.constant 0 : index
      %36 = vector.load %arg6[%c0_33, %c0_34, %c0_35, %c0_36] : memref<1x1x8x128xf32, #tpu.memory_space<vmem>>, vector<1x1x8x128xf32>
      %37 = vector.shape_cast %36 : vector<1x1x8x128xf32> to vector<1x8x128xf32>
      %38 = vector.shape_cast %35 : vector<1x8x128xf32> to vector<1x1x8x128xf32>
      tpu.vector_store %arg6[%c0_33, %c0_34, %c0_35, %c0_36], %38 {strides = array<i32>} : memref<1x1x8x128xf32, #tpu.memory_space<vmem>>, vector<1x1x8x128xf32>,
    } else {
    }
    %cst = arith.constant 0.000000e+00 : f32
    %3 = vector.broadcast %cst : f32 to vector<1x8x128xf32>
    %cst_1 = arith.constant 0.000000e+00 : f32
    %4 = vector.broadcast %cst_1 : f32 to vector<1x8x128xf32>
    %c0 = arith.constant 0 : index
    %c0_2 = arith.constant 0 : index
    %c0_3 = arith.constant 0 : index
    %5 = vector.load %arg3[%c0, %c0_2, %c0_3] : memref<1x8x128xf32, #tpu.memory_space<vmem>>, vector<1x8x128xf32>
    %c0_4 = arith.constant 0 : index
    %c0_5 = arith.constant 0 : index
    %c0_6 = arith.constant 0 : index
    %6 = vector.load %arg4[%c0_4, %c0_5, %c0_6] : memref<1x8x128xf32, #tpu.memory_space<vmem>>, vector<1x8x128xf32>
    %cst_7 = arith.constant 0.000000e+00 : f32
    %7 = vector.broadcast %cst_7 : f32 to vector<1x8x128xf32>
    %cst_8 = arith.constant 0.000000e+00 : f32
    %8 = vector.broadcast %cst_8 : f32 to vector<1x8x128xf32>
    %9 = vector.shape_cast %5 : vector<1x8x128xf32> to vector<1x1x8x128xf32>
    %10 = vector.shape_cast %6 : vector<1x8x128xf32> to vector<1x1x8x128xf32>
    %11 = arith.mulf %9, %10 : vector<1x1x8x128xf32>
    %cst_9 = arith.constant dense<0.000000e+00> : vector<1x8x128xf32>
    %12 = vector.multi_reduction <add>, %11, %cst_9 [1] : vector<1x1x8x128xf32> to vector<1x8x128xf32>
    %13 = arith.addf %7, %12 : vector<1x8x128xf32>
    %14 = arith.addf %9, %10 : vector<1x1x8x128xf32>
    %cst_10 = arith.constant dense<0.000000e+00> : vector<1x8x128xf32>
    %15 = vector.multi_reduction <add>, %14, %cst_10 [1] : vector<1x1x8x128xf32> to vector<1x8x128xf32>
    %16 = arith.addf %8, %15 : vector<1x8x128xf32>
    %17 = arith.addf %3, %13 : vector<1x8x128xf32>
    %18 = arith.addf %4, %16 : vector<1x8x128xf32>
    %c0_11 = arith.constant 0 : index
    %c0_12 = arith.constant 0 : index
    %c0_13 = arith.constant 0 : index
    %c0_14 = arith.constant 0 : index
    %19 = vector.load %arg5[%c0_11, %c0_12, %c0_13, %c0_14] : memref<1x1x8x128xf32, #tpu.memory_space<vmem>>, vector<1x1x8x128xf32>
    %20 = vector.shape_cast %19 : vector<1x1x8x128xf32> to vector<1x8x128xf32>
    %21 = arith.addf %20, %17 : vector<1x8x128xf32>
    %c0_15 = arith.constant 0 : index
    %c0_16 = arith.constant 0 : index
    %c0_17 = arith.constant 0 : index
    %c0_18 = arith.constant 0 : index
    %22 = vector.load %arg5[%c0_15, %c0_16, %c0_17, %c0_18] : memref<1x1x8x128xf32, #tpu.memory_space<vmem>>, vector<1x1x8x128xf32>
    %23 = vector.shape_cast %22 : vector<1x1x8x128xf32> to vector<1x8x128xf32>
    %24 = vector.shape_cast %21 : vector<1x8x128xf32> to vector<1x1x8x128xf32>
    tpu.vector_store %arg5[%c0_15, %c0_16, %c0_17, %c0_18], %24 {strides = array<i32>} : memref<1x1x8x128xf32, #tpu.memory_space<vmem>>, vector<1x1x8x128xf32>,
    %c0_19 = arith.constant 0 : index
    %c0_20 = arith.constant 0 : index
    %c0_21 = arith.constant 0 : index
    %c0_22 = arith.constant 0 : index
    %25 = vector.load %arg6[%c0_19, %c0_20, %c0_21, %c0_22] : memref<1x1x8x128xf32, #tpu.memory_space<vmem>>, vector<1x1x8x128xf32>
    %26 = vector.shape_cast %25 : vector<1x1x8x128xf32> to vector<1x8x128xf32>
    %27 = arith.addf %26, %18 : vector<1x8x128xf32>
    %c0_23 = arith.constant 0 : index
    %c0_24 = arith.constant 0 : index
    %c0_25 = arith.constant 0 : index
    %c0_26 = arith.constant 0 : index
    %28 = vector.load %arg6[%c0_23, %c0_24, %c0_25, %c0_26] : memref<1x1x8x128xf32, #tpu.memory_space<vmem>>, vector<1x1x8x128xf32>
    %29 = vector.shape_cast %28 : vector<1x1x8x128xf32> to vector<1x8x128xf32>
    %30 = vector.shape_cast %27 : vector<1x8x128xf32> to vector<1x1x8x128xf32>
    tpu.vector_store %arg6[%c0_23, %c0_24, %c0_25, %c0_26], %30 {strides = array<i32>} : memref<1x1x8x128xf32, #tpu.memory_space<vmem>>, vector<1x1x8x128xf32>,
    return
  }
  func.func @transform_0(%arg0: i32, %arg1: i32, %arg2: i32) -> (i32, i32, i32) {
    %c1_i32 = arith.constant 1 : i32
    %0 = arith.muli %arg0, %c1_i32 : i32
    %1 = arith.addi %0, %arg2 : i32
    %c0_i32 = arith.constant 0 : i32
    %c0_i32_0 = arith.constant 0 : i32
    return %arg1, %1, %c0_i32 : i32, i32, i32
  }
  func.func @transform_1(%arg0: i32, %arg1: i32, %arg2: i32) -> (i32, i32, i32) {
    %c1_i32 = arith.constant 1 : i32
    %0 = arith.muli %arg0, %c1_i32 : i32
    %1 = arith.addi %0, %arg2 : i32
    %c0_i32 = arith.constant 0 : i32
    %c0_i32_0 = arith.constant 0 : i32
    return %arg1, %1, %c0_i32 : i32, i32, i32
  }
  func.func @transform_2(%arg0: i32, %arg1: i32, %arg2: i32) -> (i32, i32, i32, i32) {
    %c0_i32 = arith.constant 0 : i32
    %c0_i32_0 = arith.constant 0 : i32
    %c0_i32_1 = arith.constant 0 : i32
    return %arg1, %arg0, %c0_i32, %c0_i32_0 : i32, i32, i32, i32
  }
  func.func @transform_3(%arg0: i32, %arg1: i32, %arg2: i32) -> (i32, i32, i32, i32) {
    %c0_i32 = arith.constant 0 : i32
    %c0_i32_0 = arith.constant 0 : i32
    %c0_i32_1 = arith.constant 0 : i32
    return %arg1, %arg0, %c0_i32, %c0_i32_0 : i32, i32, i32, i32
  }
}

</mosaic_0001>

<bundles_post_ra>
// kernel: tpu_custom_call.1
= control target key start
LH: loop header
LB: loop body
LE: loop exit
PB: predicated region body
PF: predicated region fallthrough
CT: control target
= control target key end

     0   :  { %9 = vsyncpa [#allocation3], 0  ;;  %s923_s0 = inlined_call_operand.hbm [shape: f32[2,8,128], index: 0, kind: input, shape index: {}]   ;;  %s924_s1 = inlined_call_operand.hbm [shape: f32[2,8,128], index: 1, kind: input, shape index: {}]   ;;  %s925_s2 = inlined_call_operand.hbm [shape: f32[2,1,8,128], index: 2, kind: output, shape index: {0}]   ;;  %s926_s3 = inlined_call_operand.hbm [shape: f32[2,1,8,128], index: 3, kind: output, shape index: {1}]  }
   0x1   :  { %11 = vsyncpa [#allocation3 + $0x1], 0 }
   0x2   :  { %12 = vsyncpa [#allocation6], 0 }
   0x3   :  { %14 = vsyncpa [#allocation6 + $0x1], 0 }
   0x4   :  { %15 = vsyncpa [#allocation4], 0 }
   0x5   :  { %17 = vsyncpa [#allocation4 + $0x1], 0 }
   0x6   :  { %18 = vsyncpa [#allocation9], 0 }
   0x7   :  { %20 = vsyncpa [#allocation9 + $0x1], 0  ;;  %s769_s12 = smov 0   ;;  %s771_s13 = smov 0  }
   0x8   :  { %s773_s14 = smov 0   ;;  %s775_s15 = smov 0  }
   0x9   :  { %s777_s16 = smov 0   ;;  %s779_s17 = smov 0  }
   0xa LB: > { %s477_s18 = sadd.s32 4294967295, %s747_s17   ;;  %s478_s19 = sadd.s32 4294967294, %s747_s17   ;;  %s747_s17 = sphi %s779_s17, %s26_s17   ;;  %s743_s16 = sphi %s777_s16, %s935_s16   ;;  %s739_s15 = sphi %s775_s15, %s934_s15   ;;  %s735_s14 = sphi %s773_s14, %s933_s14   ;;  %s731_s13 = sphi %s771_s13, %s932_s13   ;;  %s727_s12 = sphi %s769_s12, %s931_s12  }
   0xb   : > { %s41_s20 = sadd.s32 1, %s743_s16  ;;  %s56_s21 = sadd.s32 1, %s735_s14 }
   0xc   : > { %p43_p0 = scmp.ge.s32.totalorder %s41_s20, 2  ;;  %p63_p1 = scmp.ne.s32.totalorder %s735_s14, %s731_s13 }
   0xd   : > { %p64_p2 = scmp.eq.s32.totalorder %s747_s17, 0  ;;  %p69_p3 = scmp.ne.s32.totalorder %s731_s13, %s727_s12 }
   0xe   : > { %s937_s20 = smov (%p43_p0, %s41_s20), 0  ;;  %p70_p5 = scmp.eq.s32.totalorder %s477_s18, 0 }
   0xf   : > { %p810_p4 = por %p64_p2, %p63_p1  ;;  %s51_s23 = ssub.s32 %s743_s16, %s937_s20 }
  0x10   : > { %p125_p6 = scmp.eq.s32.totalorder %s477_s18, 1  ;;  %p54_p7 = scmp.eq.s32.totalorder %s51_s23, 0 }
  0x11   : > { %p816_p8 = por %p70_p5, %p69_p3  ;;  %p131_p10 = scmp.eq.s32.totalorder %s478_s19, 1 }
  0x12   : > { %p820_p9 = por %p125_p6, %p63_p1  ;;  %p480_p12 = scmp.ge.s32.totalorder %s747_s17, 2 }
  0x13   : > { %s825_s26 = scalar_select %p54_p7, %s735_s14, %s56_s21  }
  0x14   : > { %p827_p11 = por %p131_p10, %p69_p3  ;;  %p518_p13 = scmp.lt.s32.totalorder %s747_s17, 2 }
  0x15   : > { %s179_s28 = sand.u32 1, %s735_s14   ;;  %s482_s30 = sshll.u32 %s743_s16, 3 }
  0x16   : > { %s481_s29 = sshll.u32 %s179_s28, 3  ;;  %s189_s6 = scalar_lea.hbm %s923_s0, %s482_s30 }
  0x17   : > { %s183_s7 = scalar_lea.vmem [#allocation2], %s481_s29  ;;  %s191_s9 = sshll.u32 %s189_s6, 4  ;;  %s192_s9 = int_to_ptr.hbm [resolvable:$true] %s191_s9 }
  0x18   : > { %s193_s8 = sshll.u32 %s183_s7, 4  ;;  %p505_p0 = pnand %p518_p13, %p810_p4  ;;  %s194_s8 = int_to_ptr.vmem [resolvable:$true] %s193_s8 }
  0x19   : > { %p485_p1 = scmp.ge.s32.totalorder %s747_s17, 1  ;;  %p219_p2 = scmp.lt.s32.totalorder %s747_s17, 3 }
  0x1a   : > { %s180_s10 = scalar_lea.sflag [#allocation3], %s179_s28  ;;  %s210_s19 = scalar_lea.hbm %s924_s1, %s482_s30 }
  0x1b   : > { %507 = dma.hbm_to_vmem [thread:$0]  (!%p505_p0), %s192_s9, 128, %s194_s8, %s180_s10  }
  0x1c   : > { %p220_p3 = pnand %p485_p1, %p219_p2  ;;  %s204_s21 = scalar_lea.vmem [#allocation5], %s481_s29 }
  0x1d   : > { %s214_s23 = sshll.u32 %s204_s21, 4  ;;  %s212_s4 = sshll.u32 %s210_s19, 4  ;;  %s215_s23 = int_to_ptr.vmem [resolvable:$true] %s214_s23  ;;  %s213_s4 = int_to_ptr.hbm [resolvable:$true] %s212_s4 }
  0x1e   : > { %s201_s5 = scalar_lea.sflag [#allocation6], %s179_s28  ;;  %223 = sbr.rel (%p220_p3) target bundleno = 67 (0x43), region = 28 }
  0x1f   : > { %510 = dma.hbm_to_vmem [thread:$0]  (!%p505_p0), %s213_s4, 128, %s215_s23, %s201_s5  }
  0x20   : > { %s846_s22 = sand.u32 (!%p220_p3), 1, %s731_s13  }
  0x21   : > { %s486_s6 = sshll.u32 (!%p220_p3), %s846_s22, 3  ;;  %s226_s7 = scalar_lea.sflag (!%p220_p3), [#allocation3], %s846_s22 }
  0x22   : > { %s229_s8 = scalar_lea.vmem (!%p220_p3), [#allocation2], %s486_s6 }
  0x23   : > { %710 = dma.done.wait (%p816_p8), %s226_s7, 128  }
  0x24   : > { %712 = vsyncadd (%p816_p8), %s226_s7, 4294967168  ;;  %s236_s29 = scalar_lea.sflag [#allocation6], %s846_s22  ;;  %s239_s28 = scalar_lea.vmem [#allocation5], %s486_s6 }
  0x25   : > { %714 = dma.done.wait (%p816_p8), %s236_s29, 128  }
  0x26   : > { %716 = vsyncadd (%p816_p8), %s236_s29, 4294967168  ;;  %s492_s30 = sshll.u32 %s739_s15, 3  ;;  %s265_s23 = scalar_lea.vmem [#allocation7], %s486_s6  ;;  %v281_v0 = vld [vmem:[%s229_s8] sm:$0xff]  ;;  %v282_v1 = vld [vmem:[%s239_s28] sm:$0xff] }
  0x27   : > { %s314_s11 = scalar_lea.hbm %s925_s2, %s492_s30  ;;  %s329_s21 = scalar_lea.hbm %s926_s3, %s492_s30  ;;  %v283_v2 = vmul.f32 %v282_v1, %v281_v0  ;;  %v286_v3 = vadd.f32 %v282_v1, %v281_v0 }
  0x28   : > { %s866_s4 = sshll.u32 %s265_s23, 4  ;;  %s318_s5 = sshll.u32 %s314_s11, 4  ;;  %s317_s4 = int_to_ptr.vmem [resolvable:$true] %s866_s4  ;;  %s319_s5 = int_to_ptr.hbm [resolvable:$true] %s318_s5 }
  0x29   : > { %s272_s15 = scalar_lea.vmem [#allocation8], %s486_s6  ;;  %s333_s7 = sshll.u32 %s329_s21, 4  ;;  %293 = vst [vmem:[%s265_s23] sm:$0xff] %v283_v2  ;;  %s872_s7 = int_to_ptr.hbm [resolvable:$true] %s333_s7 }
  0x2a   : > { %s868_s24 = sshll.u32 %s272_s15, 4  ;;  %296 = vst [vmem:[%s272_s15] sm:$0xff] %v286_v3  ;;  %s298_s29 = scalar_lea.sflag [#allocation4], %s846_s22  ;;  %s332_s24 = int_to_ptr.vmem [resolvable:$true] %s868_s24 }
  0x2b   : > { %s643_s30 = sshra.s32 %s319_s5, 4  ;;  %s649_s9 = scalar_lea.hbm %s925_s2, 16  ;;  %s644_s30 = int_to_ptr.hbm [resolvable:$true] %s643_s30 }
  0x2c   : > { %s645_s8 = scalar_lea.hbm %s644_s30, 8  ;;  %p650_p7 = scmp.lt.s32.totalorder %s644_s30, %s925_s2 }
  0x2d   : > { %p646_p4 = scmp.ne.s32.totalorder %s644_s30, %s645_s8  ;;  %p651_p8 = scmp.lt.s32.totalorder %s649_s9, %s645_s8 }
  0x2f   : > { %p647_p5 = pnand %p646_p4, %p820_p9  ;;  %p652_p10 = por %p651_p8, %p650_p7 }
  0x31   : > { %p648_p6 = pneg %p647_p5 }
  0x33   : > { %p653_p13 = pnand %p652_p10, %p648_p6 }
  0x35   : > { %656 = shalt.err (!%p653_p13)
}
  0x36   : > { %500 = dma.vmem_to_hbm [thread:$0]  (%p820_p9), %s317_s4, 128, %s319_s5, %s298_s29  }
  0x37   : > { %s303_s18 = scalar_lea.sflag [#allocation9], %s846_s22  ;;  %s671_s19 = sshra.s32 %s872_s7, 4  ;;  %s672_s19 = int_to_ptr.hbm [resolvable:$true] %s671_s19 }
  0x38   : > { %s673_s21 = scalar_lea.hbm %s672_s19, 8  ;;  %s677_s30 = scalar_lea.hbm %s926_s3, 16 }
  0x39   : > { %p674_p0 = scmp.ne.s32.totalorder %s672_s19, %s673_s21  ;;  %p678_p3 = scmp.lt.s32.totalorder %s672_s19, %s926_s3 }
  0x3a   : > { %p679_p4 = scmp.lt.s32.totalorder %s677_s30, %s673_s21 }
  0x3b   : > { %p675_p1 = pnand %p674_p0, %p820_p9 }
  0x3c   : > { %p680_p5 = por %p679_p4, %p678_p3 }
  0x3d   : > { %p676_p2 = pneg %p675_p1 }
  0x3f   : > { %p681_p6 = pnand %p680_p5, %p676_p2 }
  0x41   : > { %684 = shalt.err (!%p681_p6)
}
  0x42   : > { %501 = dma.vmem_to_hbm [thread:$0]  (%p820_p9), %s332_s24, 128, %s872_s7, %s303_s18  }
  0x43 PF: > { %s345_s22 = sand.u32 1, %s727_s12   ;;  %p512_p7 = pnand %p480_p12, %p827_p11 }
  0x44   : > { %s346_s4 = scalar_lea.sflag [#allocation4], %s345_s22 }
  0x45   : > { %p513_p8 = pneg %p512_p7 }
  0x47   : > { %718 = dma.done.wait (%p513_p8), %s346_s4, 128  }
  0x48   : > { %720 = vsyncadd (%p513_p8), %s346_s4, 4294967168  ;;  %s356_s5 = scalar_lea.sflag [#allocation9], %s345_s22 }
  0x49   : > { %722 = dma.done.wait (%p513_p8), %s356_s5, 128  }
  0x4a   : > { %724 = vsyncadd (%p513_p8), %s356_s5, 4294967168  ;;  %s26_s17 = sadd.s32 1, %s747_s17   ;;  %s931_s12 = smov %s731_s13 }
  0x4b   : > { %p23_p10 = scmp.ge.s32.totalorder %s26_s17, 4   ;;  %s932_s13 = smov %s735_s14 }
  0x4c   : > { %s933_s14 = smov %s825_s26  ;;  %s934_s15 = smov %s743_s16 }
  0x4d   : > { %s935_s16 = smov %s937_s20  ;;  %25 = sbr.rel (!%p23_p10) target bundleno = 10 (0xa), region = 107 }
  0x52   :  { %362 = vsyncpa [#allocation3], 1 }
  0x53   :  { %364 = vsyncpa [#allocation3 + $0x1], 1 }
  0x54   :  { %365 = vsyncpa [#allocation6], 1 }
  0x55   :  { %367 = vsyncpa [#allocation6 + $0x1], 1 }
  0x56   :  { %368 = vsyncpa [#allocation4], 1 }
  0x57   :  { %370 = vsyncpa [#allocation4 + $0x1], 1 }
  0x58   :  { %371 = vsyncpa [#allocation9], 1 }
  0x59   :  { %373 = vsyncpa [#allocation9 + $0x1], 1 }

</bundles_post_ra>
